<compile_context>
chip_gen: v6e
topology: v6e:2x2x1
jax: 0.10.0
libtpu: 0.0.40
codegen_flags: <defaults>
</compile_context>

<pallas_src>
import jax
import jax.numpy as jnp
from jax.experimental import pallas as pl
from jax.experimental.pallas import tpu as pltpu

HIDDEN = 768          # DINOv2 base hidden size, required by nn.Linear(768, ...)
NUM_CLASSES = 2       # id2label = {0: 'Grain', 1: 'Pod'}
NUM_BBOX = 4
PATCH = 16
HEAD_LANES = 128      # fused (cls | bbox | 0) head output, padded to a full lane
MAX_B_TILE = 256      # batch tile: fills 256-wide MXU M-dim on v6e/v7x
MIN_SPLIT_B = 16      # split into >=2 tiles above this so v7x's 2 TCs both run


def _round_up(x, m):
    return (x + m - 1) // m * m


# ----------------------------------------------------------------------------
# Pallas kernel: entire forward collapsed to one lane-dense matmul + bias
# ----------------------------------------------------------------------------
def _fused_dino_kernel(pooled_ref, w_ref, b_ref, out_ref):
    """One batch tile of the whole forward pass.

    pooled_ref : [b_tile, d_patch]      bf16, token-mean-pooled patches
    w_ref      : [d_patch, HEAD_LANES]  bf16, folded weights (Wp.T @ [Wcls|Wbox|0])
    b_ref      : [1, HEAD_LANES]        f32,  folded bias   (bh + bp @ Wh)
    out_ref    : [b_tile, HEAD_LANES]   f32,  cols 0:2 = class logits, 2:6 = bbox
    """
    out_ref[...] = (
        jnp.dot(pooled_ref[...], w_ref[...], preferred_element_type=jnp.float32)
        + b_ref[...]
    )


# ----------------------------------------------------------------------------
# Parameters
# ----------------------------------------------------------------------------
def init_params(key):
    """Deterministic parameter init (PyTorch nn.Linear shapes: [out, in])."""
    k = jax.random.split(key, 6)
    d_patch = 3 * PATCH * PATCH
    w_patch = 0.02 * jax.random.normal(k[0], (HIDDEN, d_patch), jnp.float32)
    b_patch = 0.02 * jax.random.normal(k[1], (HIDDEN,), jnp.float32)
    w_cls = 0.02 * jax.random.normal(k[2], (NUM_CLASSES, HIDDEN), jnp.float32)
    b_cls = 0.02 * jax.random.normal(k[3], (NUM_CLASSES,), jnp.float32)
    w_box = 0.02 * jax.random.normal(k[4], (NUM_BBOX, HIDDEN), jnp.float32)
    b_box = 0.02 * jax.random.normal(k[5], (NUM_BBOX,), jnp.float32)
    return dict(w_patch=w_patch, b_patch=b_patch,
                w_cls=w_cls, b_cls=b_cls, w_box=w_box, b_box=b_box)


def prepare_params(params):
    """One-time weight prep (hoisted out of the forward path).

    * fuse cls + bbox heads into one lane-dense [HIDDEN, 128] slab
    * fold the (linear) patch embedding through the heads:
        W_comb = Wp.T @ Wh        (bf16 matmul operand)
        b_comb = bh + bp @ Wh     (f32, applied once after the matmul)
    """
    wh = jnp.zeros((HIDDEN, HEAD_LANES), jnp.float32)
    wh = wh.at[:, :NUM_CLASSES].set(params["w_cls"].T)
    wh = wh.at[:, NUM_CLASSES:NUM_CLASSES + NUM_BBOX].set(params["w_box"].T)

    bh = jnp.zeros((HEAD_LANES,), jnp.float32)
    bh = bh.at[:NUM_CLASSES].set(params["b_cls"])
    bh = bh.at[NUM_CLASSES:NUM_CLASSES + NUM_BBOX].set(params["b_box"])

    w_comb = params["w_patch"].T @ wh                    # [d_patch, 128] f32
    b_comb = bh + params["b_patch"] @ wh                 # [128]          f32

    return dict(w_comb=w_comb.astype(jnp.bfloat16),
                b_comb=b_comb.reshape(1, HEAD_LANES).astype(jnp.float32))


# ----------------------------------------------------------------------------
# Forward wrapper
# ----------------------------------------------------------------------------
def custom_dino_forward(x, prepped):
    """x: [B, C, H, W] float32 (NCHW). Returns {'class': [B,2], 'bbox': [B,4]}."""
    B, C, H, W = x.shape
    gh, gw = H // PATCH, W // PATCH
    d_patch = C * PATCH * PATCH

    # --- glue: pre-pool patch tokens (linear backbone => pooling commutes with
    # the patch embedding). [B, d_patch] with per-patch (C, dy, dx) order,
    # identical to patchify -> embed -> mean but with patch-count-fold fewer MACs.
    pooled = x.reshape(B, C, gh, PATCH, gw, PATCH).mean(axis=(2, 4))
    pooled = pooled.reshape(B, d_patch)

    # batch tiling: sublane-aligned, capped at MAX_B_TILE; batches >= MIN_SPLIT_B
    # are split into >= 2 grid steps so "parallel" can use both v7x TensorCores.
    b_pad = _round_up(B, 8)
    if b_pad > MAX_B_TILE:
        b_tile = MAX_B_TILE
        b_pad = _round_up(b_pad, b_tile)
    elif b_pad >= MIN_SPLIT_B:
        b_tile = _round_up(-(-b_pad // 2), 8)
        b_pad = _round_up(b_pad, b_tile)
    else:
        b_tile = b_pad
    pooled = jnp.pad(pooled, ((0, b_pad - B), (0, 0))).astype(jnp.bfloat16)

    out = pl.pallas_call(
        _fused_dino_kernel,
        grid=(b_pad // b_tile,),
        out_shape=jax.ShapeDtypeStruct((b_pad, HEAD_LANES), jnp.float32),
        in_specs=[
            pl.BlockSpec((b_tile, d_patch), lambda i: (i, 0)),      # pooled
            pl.BlockSpec((d_patch, HEAD_LANES), lambda i: (0, 0)),  # W_comb (resident)
            pl.BlockSpec((1, HEAD_LANES), lambda i: (0, 0)),        # b_comb
        ],
        out_specs=pl.BlockSpec((b_tile, HEAD_LANES), lambda i: (i, 0)),
        compiler_params=pltpu.CompilerParams(
            dimension_semantics=("parallel",)),   # batch tiles -> v7x megacore
    )(pooled, prepped["w_comb"], prepped["b_comb"])

    # padded rows (>= B) hold bias-only garbage; slice them off here.
    return {
        "class": out[:B, :NUM_CLASSES],
        "bbox": out[:B, NUM_CLASSES:NUM_CLASSES + NUM_BBOX],
    }


# ----------------------------------------------------------------------------
# Reference (pure JAX, f32) for a sanity check
# ----------------------------------------------------------------------------
def reference_forward(x, params):
    B, C, H, W = x.shape
    gh, gw = H // PATCH, W // PATCH
    P = gh * gw
    patches = x.reshape(B, C, gh, PATCH, gw, PATCH)
    patches = patches.transpose(0, 2, 4, 1, 3, 5).reshape(B, P, C * PATCH * PATCH)
    emb = patches @ params["w_patch"].T + params["b_patch"]
    feat = emb.mean(axis=1)                                  # [B, 768]
    cls = feat @ params["w_cls"].T + params["b_cls"]
    box = feat @ params["w_box"].T + params["b_box"]
    return {"class": cls, "bbox": box}


if __name__ == "__main__":
    key = jax.random.PRNGKey(0)
    k_x, k_p = jax.random.split(key)

    # small deterministic input: batch=2, 3 channels, 32x32 image (4 patches)
    x = jax.random.normal(k_x, (2, 3, 32, 32), jnp.float32)
    params = init_params(k_p)
    prepped = prepare_params(params)       # one-time weight prep

    out = custom_dino_forward(x, prepped)
    jax.block_until_ready(out)

    ref = reference_forward(x, params)
    assert out["class"].shape == (2, NUM_CLASSES)
    assert out["bbox"].shape == (2, NUM_BBOX)
    # bf16 matmul operands (f32 accumulation, f32 bias) -> loose-ish tolerance
    assert jnp.allclose(out["class"], ref["class"], atol=2e-2, rtol=2e-2)
    assert jnp.allclose(out["bbox"], ref["bbox"], atol=2e-2, rtol=2e-2)

    print("KERNEL_OK")
</pallas_src>

<mosaic_0001>
module attributes {stable_mosaic.version = 11 : i64} {
  func.func @_fused_dino_kernel(%arg0: i32, %arg1: memref<8x768xbf16, #tpu.memory_space<vmem>>, %arg2: memref<768x128xbf16, #tpu.memory_space<vmem>>, %arg3: memref<1x128xf32, #tpu.memory_space<vmem>>, %arg4: memref<8x128xf32, #tpu.memory_space<vmem>>) attributes {dimension_semantics = [#tpu.dimension_semantics<parallel>], iteration_bounds = array<i64: 1>, scalar_prefetch = 0 : i64, scratch_operands = 0 : i64, tpu.core_type = #tpu.core_type<tc>, window_params = [{transform_indices = @transform_0, window_bounds = array<i64: 8, 768>}, {pipeline_mode = #tpu.pipeline_mode<synchronous>, transform_indices = @transform_1, window_bounds = array<i64: 768, 128>}, {pipeline_mode = #tpu.pipeline_mode<synchronous>, transform_indices = @transform_2, window_bounds = array<i64: 1, 128>}, {transform_indices = @transform_3, window_bounds = array<i64: 8, 128>}]} {
    %c0 = arith.constant 0 : index
    %c0_0 = arith.constant 0 : index
    %0 = vector.load %arg1[%c0, %c0_0] : memref<8x768xbf16, #tpu.memory_space<vmem>>, vector<8x768xbf16>
    %c0_1 = arith.constant 0 : index
    %c0_2 = arith.constant 0 : index
    %1 = vector.load %arg2[%c0_1, %c0_2] : memref<768x128xbf16, #tpu.memory_space<vmem>>, vector<768x128xbf16>
    %cst = arith.constant dense<0.000000e+00> : vector<8x128xf32>
    %2 = tpu.matmul %0, %1, %cst {dimension_numbers = #tpu.dot_dimension_numbers<[1], [0], [0], [1], [0, 0, 1, 1], [], []>} : vector<8x768xbf16>, vector<768x128xbf16>, vector<8x128xf32> -> vector<8x128xf32>
    %c0_3 = arith.constant 0 : index
    %c0_4 = arith.constant 0 : index
    %3 = vector.load %arg3[%c0_3, %c0_4] : memref<1x128xf32, #tpu.memory_space<vmem>>, vector<1x128xf32>
    %4 = vector.broadcast %3 : vector<1x128xf32> to vector<8x128xf32>
    %5 = arith.addf %2, %4 : vector<8x128xf32>
    %c0_5 = arith.constant 0 : index
    %c0_6 = arith.constant 0 : index
    %6 = vector.load %arg4[%c0_5, %c0_6] : memref<8x128xf32, #tpu.memory_space<vmem>>, vector<8x128xf32>
    tpu.vector_store %arg4[%c0_5, %c0_6], %5 {strides = array<i32>} : memref<8x128xf32, #tpu.memory_space<vmem>>, vector<8x128xf32>,
    return
  }
  func.func @transform_0(%arg0: i32) -> (i32, i32) {
    %c0_i32 = arith.constant 0 : i32
    %c0_i32_0 = arith.constant 0 : i32
    return %arg0, %c0_i32 : i32, i32
  }
  func.func @transform_1(%arg0: i32) -> (i32, i32) {
    %c0_i32 = arith.constant 0 : i32
    %c0_i32_0 = arith.constant 0 : i32
    %c0_i32_1 = arith.constant 0 : i32
    return %c0_i32, %c0_i32_0 : i32, i32
  }
  func.func @transform_2(%arg0: i32) -> (i32, i32) {
    %c0_i32 = arith.constant 0 : i32
    %c0_i32_0 = arith.constant 0 : i32
    %c0_i32_1 = arith.constant 0 : i32
    return %c0_i32, %c0_i32_0 : i32, i32
  }
  func.func @transform_3(%arg0: i32) -> (i32, i32) {
    %c0_i32 = arith.constant 0 : i32
    %c0_i32_0 = arith.constant 0 : i32
    return %arg0, %c0_i32 : i32, i32
  }
}

</mosaic_0001>

<bundles_post_ra>
// kernel: tpu_custom_call.1
= control target key start
LH: loop header
LB: loop body
LE: loop exit
PB: predicated region body
PF: predicated region fallthrough
CT: control target
= control target key end

     0   :  { %8 = vsyncpa [#allocation3], 0  ;;  %s877_s0 = inlined_call_operand.hbm [shape: bf16[8,768], index: 0, kind: input, shape index: {}]   ;;  %s878_s1 = inlined_call_operand.hbm [shape: bf16[768,128], index: 1, kind: input, shape index: {}]   ;;  %s879_s2 = inlined_call_operand.vmem [shape: f32[1,128], index: 2, kind: input, shape index: {}]   ;;  %s880_s3 = inlined_call_operand.hbm [shape: f32[8,128], index: 3, kind: output, shape index: {}]  }
   0x1   :  { %9 = vsyncpa [#allocation6], 0 }
   0x2   :  { %10 = vsyncpa [#allocation4], 0  ;;  %s840_s12 = smov [#allocation2]   ;;  %s841_s14 = smov [#allocation5]  }
   0x3   :  { %s17_s13 = sshll.u32 %s840_s12, 4  ;;  %s26_s15 = sshll.u32 %s841_s14, 4  ;;  %s18_s13 = int_to_ptr.vmem [resolvable:$true] %s17_s13  ;;  %s27_s15 = int_to_ptr.vmem [resolvable:$true] %s26_s15 }
   0x4   :  { %s782_s16 = scalar_lea.vmem %s18_s13, 384  ;;  %p787_p1 = scmp.lt.s32.totalorder %s18_s13, %s18_s13 }
   0x5   :  { %p783_p0 = scmp.ne.s32.totalorder %s18_s13, %s782_s16  ;;  %p788_p2 = scmp.lt.s32.totalorder %s782_s16, %s782_s16 }
   0x7   :  { %p789_p3 = por %p788_p2, %p787_p1 }
   0x9   :  { %p790_p4 = pnand %p789_p3, %p783_p0 }
   0xb   :  { %793 = shalt.err (!%p790_p4)
}
   0xc   :  { %20 = dma.hbm_to_vmem [thread:$0]  %s877_s0, 384, %s18_s13, [#allocation3]  }
   0xd   :  { %s802_s19 = scalar_lea.vmem %s27_s15, 6144  ;;  %p807_p6 = scmp.lt.s32.totalorder %s27_s15, %s27_s15 }
   0xe   :  { %p803_p5 = scmp.ne.s32.totalorder %s27_s15, %s802_s19  ;;  %p808_p7 = scmp.lt.s32.totalorder %s802_s19, %s802_s19 }
  0x10   :  { %p809_p8 = por %p808_p7, %p807_p6 }
  0x12   :  { %p810_p9 = pnand %p809_p8, %p803_p5 }
  0x14   :  { %813 = shalt.err (!%p810_p9)
}
  0x15   :  { %s842_s20 = smov 64   ;;  %s843_s21 = smov 4  }
  0x16   :  { %32 = dma.hbm_to_vmem [thread:$0]  %s878_s1, 6144, %s27_s15, [#allocation6], %s842_s20, %s842_s20, %s843_s21  }
  0x17   :  { %834 = dma.done.wait [#allocation3], 384  }
  0x18   :  { %835 = vsyncadd [#allocation3], 4294966912 }
  0x19   :  { %836 = dma.done.wait [#allocation6], 6144  }
  0x1a   :  { %837 = vsyncadd [#allocation6], 4294961152  ;;  %v720_v0 = vld [vmem:[#allocation5 + $0x78] sm:$0xff]   ;;  %v724_v4 = vld [vmem:[#allocation5 + $0x70] sm:$0xff]   ;;  %s844_s24 = smov [#allocation7]  }
  0x1b   :  { %v721_v1 = vld [vmem:[#allocation5 + $0x38] sm:$0xff]   ;;  %649 = vmatprep.subr.bf16.mxu0 %v720_v0  ;;  %v725_v5 = vld [vmem:[#allocation5 + $0x30] sm:$0xff]   ;;  %v728_v8 = vld [vmem:[#allocation5 + $0x68] sm:$0xff]   ;;  %s584_s25 = sshll.u32 %s844_s24, 4  ;;  %s585_s25 = int_to_ptr.vmem [resolvable:$true] %s584_s25 }
  0x1c   :  { %v722_v2 = vld [vmem:[#allocation5 + $0xf8] sm:$0xff]   ;;  %650 = vmatpush3.bf16.msra.mxu0 %v721_v1  ;;  %v726_v6 = vld [vmem:[#allocation5 + $0xf0] sm:$0xff]   ;;  %v729_v9 = vld [vmem:[#allocation5 + $0x28] sm:$0xff]   ;;  %s814_s26 = scalar_lea.vmem %s585_s25, 128  ;;  %p819_p11 = scmp.lt.s32.totalorder %s585_s25, %s585_s25 }
  0x1d   :  { %v723_v3 = vld [vmem:[#allocation5 + $0xb8] sm:$0xff]   ;;  %671 = vmatprep.subr.bf16.mxu1 %v722_v2  ;;  %651 = vmatprep.subr.bf16.mxu0 %v724_v4  ;;  %v727_v7 = vld [vmem:[#allocation5 + $0xb0] sm:$0xff]   ;;  %v730_v10 = vld [vmem:[#allocation5 + $0xe8] sm:$0xff]   ;;  %p815_p10 = scmp.ne.s32.totalorder %s585_s25, %s814_s26  ;;  %p820_p12 = scmp.lt.s32.totalorder %s814_s26, %s814_s26 }
  0x1e   :  { %672 = vmatpush3.bf16.msra.mxu1 %v723_v3  ;;  %v731_v11 = vld [vmem:[#allocation5 + $0xa8] sm:$0xff]   ;;  %v732_v12 = vld [vmem:[#allocation5 + $0x60] sm:$0xff]   ;;  %v736_v16 = vld [vmem:[#allocation5 + $0x58] sm:$0xff]  }
  0x1f   :  { %673 = vmatprep.subr.bf16.mxu1 %v726_v6  ;;  %v733_v13 = vld [vmem:[#allocation5 + $0x20] sm:$0xff]   ;;  %v737_v17 = vld [vmem:[#allocation5 + $0x18] sm:$0xff]   ;;  %v740_v20 = vld [vmem:[#allocation5 + $0x50] sm:$0xff]   ;;  %p821_p13 = por %p820_p12, %p819_p11 }
  0x20   :  { %652 = vmatpush3.bf16.msra.mxu0 %v725_v5  ;;  %v734_v14 = vld [vmem:[#allocation5 + $0xe0] sm:$0xff]   ;;  %v738_v18 = vld [vmem:[#allocation5 + $0xd8] sm:$0xff]   ;;  %v741_v21 = vld [vmem:[#allocation5 + $0x10] sm:$0xff]  }
  0x21   :  { %653 = vmatprep.subr.bf16.mxu0 %v728_v8  ;;  %v735_v15 = vld [vmem:[#allocation5 + $0xa0] sm:$0xff]   ;;  %v739_v19 = vld [vmem:[#allocation5 + $0x98] sm:$0xff]   ;;  %v742_v22 = vld [vmem:[#allocation5 + $0xd0] sm:$0xff]   ;;  %p822_p0 = pnand %p821_p13, %p815_p10 }
  0x22   :  { %674 = vmatpush3.bf16.msra.mxu1 %v727_v7  ;;  %v743_v23 = vld [vmem:[#allocation5 + $0x90] sm:$0xff]   ;;  %v744_v24 = vld [vmem:[#allocation5 + $0x48] sm:$0xff]   ;;  %v748_v28 = vld [vmem:[#allocation5 + $0x40] sm:$0xff]  }
  0x23   :  { %675 = vmatprep.subr.bf16.mxu1 %v730_v10  ;;  %v745_v25 = vld [vmem:[#allocation5 + $0x8] sm:$0xff]   ;;  %v749_v29 = vld [vmem:[#allocation5] sm:$0xff]   ;;  %v754_v35 = vld [vmem:[#allocation5 + $0x178] sm:$0xff]  }
  0x24   :  { %654 = vmatpush3.bf16.msra.mxu0 %v729_v9  ;;  %v746_v26 = vld [vmem:[#allocation5 + $0xc8] sm:$0xff]   ;;  %v750_v30 = vld [vmem:[#allocation5 + $0xc0] sm:$0xff]   ;;  %v43_v36 = vld [vmem:[#allocation2 + $0x8] sm:$0xff] }
  0x25   :  { %655 = vmatprep.subr.bf16.mxu0 %v732_v12  ;;  %v747_v27 = vld [vmem:[#allocation5 + $0x88] sm:$0xff]   ;;  %v753_v34 = vld [vmem:[#allocation5 + $0x80] sm:$0xff]   ;;  %v597_v37 = vcombine.low %v43_v36, %v43_v36  ;;  %v598_v38 = vcombine.high %v43_v36, %v43_v36  ;;  %v757_v39 = vld [vmem:[#allocation5 + $0x138] sm:$0xff]  }
  0x26   :  { %676 = vmatpush3.bf16.msra.mxu1 %v731_v11  ;;  %v42_v31 = vld [vmem:[#allocation2] sm:$0xff]  ;;  %v758_v40 = vld [vmem:[#allocation5 + $0x170] sm:$0xff]   ;;  %v762_v44 = vld [vmem:[#allocation5 + $0x160] sm:$0xff]  }
  0x27   :  { %677 = vmatprep.subr.bf16.mxu1 %v734_v14  ;;  %v595_v32 = vcombine.low %v42_v31, %v42_v31  ;;  %v596_v33 = vcombine.high %v42_v31, %v42_v31  ;;  %529 = vmatprep.mubr.bf16.mxu1 %v598_v38  ;;  %v759_v41 = vld [vmem:[#allocation5 + $0x130] sm:$0xff]   ;;  %v760_v42 = vld [vmem:[#allocation5 + $0x168] sm:$0xff]   ;;  %v763_v45 = vld [vmem:[#allocation5 + $0x120] sm:$0xff]  }
  0x28   :  { %656 = vmatpush3.bf16.msra.mxu0 %v733_v13  ;;  %v761_v43 = vld [vmem:[#allocation5 + $0x128] sm:$0xff]   ;;  %v764_v46 = vld [vmem:[#allocation5 + $0x158] sm:$0xff]   ;;  %v766_v49 = vld [vmem:[#allocation5 + $0x150] sm:$0xff]  }
  0x29   :  { %657 = vmatprep.subr.bf16.mxu0 %v736_v16  ;;  %489 = vmatprep.mubr.bf16.mxu0 %v596_v33  ;;  %v765_v47 = vld [vmem:[#allocation5 + $0x118] sm:$0xff]   ;;  %v767_v51 = vld [vmem:[#allocation5 + $0x110] sm:$0xff]   ;;  %v768_v52 = vld [vmem:[#allocation5 + $0x148] sm:$0xff]  }
  0x2a   :  { %678 = vmatpush3.bf16.msra.mxu1 %v735_v15  ;;  %v44_v48 = vld [vmem:[#allocation2 + $0x10] sm:$0xff]  ;;  %v769_v53 = vld [vmem:[#allocation5 + $0x108] sm:$0xff]   ;;  %v770_v54 = vld [vmem:[#allocation5 + $0x140] sm:$0xff]  }
  0x2b   :  { %679 = vmatprep.subr.bf16.mxu1 %v738_v18  ;;  %v600_v50 = vcombine.high %v44_v48, %v44_v48  ;;  %v771_v55 = vld [vmem:[#allocation5 + $0x100] sm:$0xff]   ;;  %v599_v56 = vcombine.low %v44_v48, %v44_v48  ;;  %v594_v2 = vld [vmem:[%s879_s2] ss:$0 sm:$0xff] }
  0x2c   :  { %658 = vmatpush3.bf16.msra.mxu0 %v737_v17 }
  0x2d   :  { %659 = vmatprep.subr.bf16.mxu0 %v740_v20 }
  0x2e   :  { %680 = vmatpush3.bf16.msra.mxu1 %v739_v19 }
  0x2f   :  { %681 = vmatprep.subr.bf16.mxu1 %v742_v22 }
  0x30   :  { %660 = vmatpush3.bf16.msra.mxu0 %v741_v21 }
  0x31   :  { %661 = vmatprep.subr.bf16.mxu0 %v744_v24 }
  0x32   :  { %682 = vmatpush3.bf16.msra.mxu1 %v743_v23 }
  0x33   :  { %683 = vmatprep.subr.bf16.mxu1 %v746_v26 }
  0x34   :  { %662 = vmatpush3.bf16.msra.mxu0 %v745_v25 }
  0x35   :  { %663 = vmatprep.subr.bf16.mxu0 %v748_v28 }
  0x36   :  { %684 = vmatpush3.bf16.msra.mxu1 %v747_v27 }
  0x37   :  { %685 = vmatprep.subr.bf16.mxu1 %v750_v30 }
  0x38   :  { %664 = vmatpush3.bf16.msra.mxu0 %v749_v29 }
  0x39   :  { %693 = vmatprep.subr.bf16.mxu0 %v754_v35 }
  0x3a   :  { %686 = vmatpush3.bf16.msra.mxu1 %v753_v34 }
  0x3b   :  { %490 = vmatmul.mubr.bf16.vlgmr.msra.gmra.mxu0 %v595_v32 }
  0x3c   :  { %694 = vmatpush3.bf16.msra.mxu0 %v757_v39  ;;  %569 = vmatprep.mubr.bf16.mxu0 %v600_v50 }
  0x3d   :  { %530 = vmatmul.mubr.bf16.vlgmr.msra.gmra.mxu1 %v597_v37  ;;  %695 = vmatprep.subr.bf16.mxu0 %v758_v40 }
  0x40   :  { %696 = vmatpush3.bf16.msra.mxu0 %v759_v41 }
  0x41   :  { %697 = vmatprep.subr.bf16.mxu0 %v760_v42 }
  0x44   :  { %698 = vmatpush3.bf16.msra.mxu0 %v761_v43 }
  0x45   :  { %699 = vmatprep.subr.bf16.mxu0 %v762_v44 }
  0x48   :  { %700 = vmatpush3.bf16.msra.mxu0 %v763_v45 }
  0x49   :  { %701 = vmatprep.subr.bf16.mxu0 %v764_v46 }
  0x4c   :  { %702 = vmatpush3.bf16.msra.mxu0 %v765_v47 }
  0x4d   :  { %703 = vmatprep.subr.bf16.mxu0 %v766_v49 }
  0x50   :  { %704 = vmatpush3.bf16.msra.mxu0 %v767_v51 }
  0x51   :  { %705 = vmatprep.subr.bf16.mxu0 %v768_v52 }
  0x54   :  { %706 = vmatpush3.bf16.msra.mxu0 %v769_v53 }
  0x55   :  { %707 = vmatprep.subr.bf16.mxu0 %v770_v54 }
  0x58   :  { %708 = vmatpush3.bf16.msra.mxu0 %v771_v55 }
  0x5b   :  { %570 = vmatmul.mubr.bf16.vlgmr.msra.gmra.mxu0 %v599_v56 }
  0xfb   :  { %v665_v57 = vpop.f32.mrf.mxu0 }
  0xfd   :  { %v666_v58 = vpop.f32.mrf.mxu0  ;;  %v687_v59 = vpop.f32.mrf.mxu1 }
  0xfe   :  { %v667_v1 = vadd.f32 %v666_v58, %v665_v57 }
  0xff   :  { %v668_v60 = vpop.f32.mrf.mxu0  ;;  %v688_v61 = vpop.f32.mrf.mxu1 }
 0x100   :  { %v492_v3 = vadd.f32 %v667_v1, %v594_v2  ;;  %v689_v4 = vadd.f32 %v688_v61, %v687_v59 }
 0x101   :  { %v669_v62 = vpop.f32.mrf.mxu0  ;;  %v690_v63 = vpop.f32.mrf.mxu1 }
 0x102   :  { %v532_v7 = vadd.f32 %v689_v4, %v492_v3 }
 0x103   :  { %v691_v0 = vpop.f32.mrf.mxu1 }
 0x11b   :  { %v709_v5 = vpop.f32.mrf.mxu0 }
 0x11d   :  { %v710_v6 = vpop.f32.mrf.mxu0 }
 0x11e   :  { %v711_v8 = vadd.f32 %v710_v6, %v709_v5 }
 0x11f   :  { %v712_v9 = vpop.f32.mrf.mxu0 }
 0x120   :  { %v572_v10 = vadd.f32 %v711_v8, %v532_v7 }
 0x121   :  { %v713_v11 = vpop.f32.mrf.mxu0 }
 0x122   :  { %577 = vst [vmem:[#allocation7] sm:$0xff] %v572_v10 }
 0x123   :  { %825 = shalt.err (!%p822_p0)
}
 0x124   :  { %587 = dma.vmem_to_hbm [thread:$0]  %s585_s25, 128, %s880_s3, [#allocation4]  }
 0x125   :  { %838 = dma.done.wait [#allocation4], 128  }
 0x126   :  { %839 = vsyncadd [#allocation4], 4294967168 }
 0x127   :  { %591 = vsyncpa [#allocation3], 1 }
 0x128   :  { %592 = vsyncpa [#allocation6], 1 }
 0x129   :  { %593 = vsyncpa [#allocation4], 1 }

</bundles_post_ra>
